<compile_context>
chip_gen: v7x
topology: tpu7x:2x2x1
jax: 0.10.0
libtpu: 0.0.40
codegen_flags: <defaults>
</compile_context>

<pallas_src>
import functools

import jax
import jax.numpy as jnp
from jax.experimental import pallas as pl
from jax.experimental.pallas import tpu as pltpu

_LANE = 128


def _q_index_kernel(x_ref, y_ref, o_ref,
                    sx_ref, sy_ref, sxx_ref, syy_ref, sxy_ref,
                    *, n_elems, t_rows, num_tiles, tail_rows):
    """Per grid step: x_ref/y_ref are (t_rows, 128) native dtype; o_ref (8, 128) f32.

    s*_ref: (8, 128) f32 moment accumulators, persist across the tile axis and
    are reset per image (batch is the outer grid axis).
    """
    t = pl.program_id(1)

    @pl.when(t == 0)
    def _init():
        for r in (sx_ref, sy_ref, sxx_ref, syy_ref, sxy_ref):
            r[...] = jnp.zeros_like(r)

    def _accumulate(valid_rows):
        x = x_ref[...]
        y = y_ref[...]
        if valid_rows is not None:
            # Ragged tail tile: rows >= valid_rows are out-of-bounds garbage.
            # Mask BEFORE any arithmetic (OOB bytes may be anything, incl. NaN).
            row = jax.lax.broadcasted_iota(jnp.int32, (t_rows, _LANE), 0)
            keep = row < valid_rows
            x = jnp.where(keep, x, jnp.zeros_like(x))
            y = jnp.where(keep, y, jnp.zeros_like(y))
        # Cast from native dtype after the VMEM load; accumulate per-lane /
        # per-sublane partial sums with vreg-aligned adds only (no XLU here).
        xf = x.astype(jnp.float32).reshape(t_rows // 8, 8, _LANE)
        yf = y.astype(jnp.float32).reshape(t_rows // 8, 8, _LANE)
        sx_ref[...] += jnp.sum(xf, axis=0)
        sy_ref[...] += jnp.sum(yf, axis=0)
        sxx_ref[...] += jnp.sum(xf * xf, axis=0)
        syy_ref[...] += jnp.sum(yf * yf, axis=0)
        sxy_ref[...] += jnp.sum(xf * yf, axis=0)

    last = num_tiles - 1
    if tail_rows == t_rows:
        # Tiles divide the row count exactly: never mask.
        _accumulate(None)
    else:
        @pl.when(t < last)
        def _full_tiles():
            _accumulate(None)

        @pl.when(t == last)
        def _tail_tile():
            _accumulate(tail_rows)

    @pl.when(t == last)
    def _finalize():
        sx = jnp.sum(sx_ref[...], keepdims=True)     # (1, 1)
        sy = jnp.sum(sy_ref[...], keepdims=True)
        sxx = jnp.sum(sxx_ref[...], keepdims=True)
        syy = jnp.sum(syy_ref[...], keepdims=True)
        sxy = jnp.sum(sxy_ref[...], keepdims=True)

        inv_n = 1.0 / n_elems
        dof = float(n_elems - 1) if n_elems > 1 else 1.0
        xm = sx * inv_n
        ym = sy * inv_n
        # torch.var default: unbiased (N-1); covariance is the biased
        # mean(x*y) - mean(x)*mean(y) — exactly what the PyTorch module does.
        xv = (sxx - sx * sx * inv_n) / dof
        yv = (syy - sy * sy * inv_n) / dof
        cov = sxy * inv_n - xm * ym
        q = 4.0 * cov * xm * ym / ((xv + yv) * (xm * xm + ym * ym))   # (1, 1)
        o_ref[...] = jnp.broadcast_to(q, (8, _LANE))


def q_index(inp, tgt):
    """Pallas implementation of Q_Index.forward(input, target) -> scalar."""
    assert inp.shape == tgt.shape
    b = inp.shape[0]
    x = inp.reshape(b, -1)
    y = tgt.reshape(b, -1)
    n = x.shape[1]                                    # true pixel count / image

    itemsize = jnp.dtype(x.dtype).itemsize
    sub = max(8, 32 // itemsize)      # sublane packing: 8 f32, 16 bf16, 32 int8

    # Lane alignment only: pad iff n is not a multiple of 128 (or the image is
    # smaller than one (sub, 128) tile).  Zero padding contributes nothing to
    # any moment; the true n is used in the final formulas.
    # TODO(synk): a fully copy-free path for n % 128 != 0 would lane-mask the
    # last partial row in-kernel instead of this (rare, small-case) pad.
    n_pad = max(pl.cdiv(n, _LANE) * _LANE, sub * _LANE)
    if n_pad != n:
        x = jnp.pad(x, ((0, 0), (0, n_pad - n)))
        y = jnp.pad(y, ((0, 0), (0, n_pad - n)))
    rows = n_pad // _LANE

    # ~2 MiB per input block per grid step (independent of B), rounded to the
    # dtype's sublane multiple and never exceeding the sublane-aligned rows.
    t_rows = min(4096, (2 << 20) // (_LANE * itemsize))
    t_rows = max(sub, (t_rows // sub) * sub)
    t_rows = min(t_rows, (rows // sub) * sub)
    num_tiles = pl.cdiv(rows, t_rows)
    tail_rows = rows - (num_tiles - 1) * t_rows       # valid rows in last tile

    x3 = x.reshape(b, rows, _LANE)    # free: row-major split of the last axis
    y3 = y.reshape(b, rows, _LANE)

    kernel = functools.partial(_q_index_kernel, n_elems=n, t_rows=t_rows,
                               num_tiles=num_tiles, tail_rows=tail_rows)

    out = pl.pallas_call(
        kernel,
        out_shape=jax.ShapeDtypeStruct((b, 8, _LANE), jnp.float32),
        grid_spec=pltpu.PrefetchScalarGridSpec(
            num_scalar_prefetch=0,
            grid=(b, num_tiles),
            in_specs=[
                pl.BlockSpec((None, t_rows, _LANE), lambda bi, t: (bi, t, 0)),
                pl.BlockSpec((None, t_rows, _LANE), lambda bi, t: (bi, t, 0)),
            ],
            out_specs=pl.BlockSpec((None, 8, _LANE), lambda bi, t: (bi, 0, 0)),
            scratch_shapes=[pltpu.VMEM((8, _LANE), jnp.float32)] * 5,
        ),
        compiler_params=pltpu.CompilerParams(
            # Batch axis parallel (v7x megacore uses both TensorCores);
            # the pixel-tile axis carries the moment accumulators.
            dimension_semantics=("parallel", "arbitrary"),
            vmem_limit_bytes=32 << 20,
        ),
    )(x3, y3)
    # Per-image Q is broadcast over its (8, 128) block; batch mean in JAX.
    return jnp.mean(out[:, 0, 0])


def q_index_ref(inp, tgt):
    """Pure-JAX reference mirroring the PyTorch module."""
    b = inp.shape[0]
    x = inp.reshape(b, -1).astype(jnp.float32)
    y = tgt.reshape(b, -1).astype(jnp.float32)
    n = x.shape[1]
    xm = x.mean(-1)
    ym = y.mean(-1)
    xv = ((x - xm[:, None]) ** 2).sum(-1) / (n - 1)
    yv = ((y - ym[:, None]) ** 2).sum(-1) / (n - 1)
    cov = (x * y).mean(-1) - xm * ym
    q = 4.0 * cov * xm * ym / ((xv + yv) * (xm ** 2 + ym ** 2))
    return q.mean()


if __name__ == "__main__":
    key = jax.random.PRNGKey(0)
    k1, k2, k3, k4 = jax.random.split(key, 4)

    # Case 1: grayscale NCHW, batch=2, 16x16 — single tile, lane-padded path.
    target1 = jax.random.uniform(k1, (2, 1, 16, 16), dtype=jnp.float32)
    inp1 = target1 + 0.1 * jax.random.normal(k2, (2, 1, 16, 16), dtype=jnp.float32)
    q1 = jax.block_until_ready(q_index(inp1, target1))
    r1 = q_index_ref(inp1, target1)
    assert jnp.allclose(q1, r1, rtol=1e-4, atol=1e-5), (q1, r1)

    # Case 2: 40x40 — multi-tile grid with a masked ragged tail tile.
    target2 = jax.random.uniform(k3, (2, 1, 40, 40), dtype=jnp.float32)
    inp2 = target2 + 0.1 * jax.random.normal(k4, (2, 1, 40, 40), dtype=jnp.float32)
    q2 = jax.block_until_ready(q_index(inp2, target2))
    r2 = q_index_ref(inp2, target2)
    assert jnp.allclose(q2, r2, rtol=1e-4, atol=1e-5), (q2, r2)

    print("KERNEL_OK")
</pallas_src>

<mosaic_0001>
module attributes {stable_mosaic.version = 11 : i64} {
  func.func @_q_index_kernel(%arg0: i32, %arg1: i32, %arg2: memref<1x8x128xf32, #tpu.memory_space<vmem>>, %arg3: memref<1x8x128xf32, #tpu.memory_space<vmem>>, %arg4: memref<1x8x128xf32, #tpu.memory_space<vmem>>, %arg5: memref<8x128xf32, #tpu.memory_space<vmem>>, %arg6: memref<8x128xf32, #tpu.memory_space<vmem>>, %arg7: memref<8x128xf32, #tpu.memory_space<vmem>>, %arg8: memref<8x128xf32, #tpu.memory_space<vmem>>, %arg9: memref<8x128xf32, #tpu.memory_space<vmem>>) attributes {dimension_semantics = [#tpu.dimension_semantics<parallel>, #tpu.dimension_semantics<arbitrary>], iteration_bounds = array<i64: 2, 1>, scalar_prefetch = 0 : i64, scratch_operands = 5 : i64, tpu.core_type = #tpu.core_type<tc>, window_params = [{transform_indices = @transform_0, window_bounds = array<i64: 1, 8, 128>}, {transform_indices = @transform_1, window_bounds = array<i64: 1, 8, 128>}, {transform_indices = @transform_2, window_bounds = array<i64: 1, 8, 128>}]} {
    %c0_i32 = arith.constant 0 : i32
    %0 = arith.cmpi eq, %arg1, %c0_i32 : i32
    %1 = arith.extui %0 : i1 to i32
    %c0_i32_0 = arith.constant 0 : i32
    %2 = arith.cmpi ne, %1, %c0_i32_0 : i32
    scf.if %2 {
      %cst_32 = arith.constant 0.000000e+00 : f32
      %35 = vector.broadcast %cst_32 : f32 to vector<8x128xf32>
      %c0_33 = arith.constant 0 : index
      %c0_34 = arith.constant 0 : index
      %36 = vector.load %arg5[%c0_33, %c0_34] : memref<8x128xf32, #tpu.memory_space<vmem>>, vector<8x128xf32>
      tpu.vector_store %arg5[%c0_33, %c0_34], %35 {strides = array<i32>} : memref<8x128xf32, #tpu.memory_space<vmem>>, vector<8x128xf32>,
      %cst_35 = arith.constant 0.000000e+00 : f32
      %37 = vector.broadcast %cst_35 : f32 to vector<8x128xf32>
      %c0_36 = arith.constant 0 : index
      %c0_37 = arith.constant 0 : index
      %38 = vector.load %arg6[%c0_36, %c0_37] : memref<8x128xf32, #tpu.memory_space<vmem>>, vector<8x128xf32>
      tpu.vector_store %arg6[%c0_36, %c0_37], %37 {strides = array<i32>} : memref<8x128xf32, #tpu.memory_space<vmem>>, vector<8x128xf32>,
      %cst_38 = arith.constant 0.000000e+00 : f32
      %39 = vector.broadcast %cst_38 : f32 to vector<8x128xf32>
      %c0_39 = arith.constant 0 : index
      %c0_40 = arith.constant 0 : index
      %40 = vector.load %arg7[%c0_39, %c0_40] : memref<8x128xf32, #tpu.memory_space<vmem>>, vector<8x128xf32>
      tpu.vector_store %arg7[%c0_39, %c0_40], %39 {strides = array<i32>} : memref<8x128xf32, #tpu.memory_space<vmem>>, vector<8x128xf32>,
      %cst_41 = arith.constant 0.000000e+00 : f32
      %41 = vector.broadcast %cst_41 : f32 to vector<8x128xf32>
      %c0_42 = arith.constant 0 : index
      %c0_43 = arith.constant 0 : index
      %42 = vector.load %arg8[%c0_42, %c0_43] : memref<8x128xf32, #tpu.memory_space<vmem>>, vector<8x128xf32>
      tpu.vector_store %arg8[%c0_42, %c0_43], %41 {strides = array<i32>} : memref<8x128xf32, #tpu.memory_space<vmem>>, vector<8x128xf32>,
      %cst_44 = arith.constant 0.000000e+00 : f32
      %43 = vector.broadcast %cst_44 : f32 to vector<8x128xf32>
      %c0_45 = arith.constant 0 : index
      %c0_46 = arith.constant 0 : index
      %44 = vector.load %arg9[%c0_45, %c0_46] : memref<8x128xf32, #tpu.memory_space<vmem>>, vector<8x128xf32>
      tpu.vector_store %arg9[%c0_45, %c0_46], %43 {strides = array<i32>} : memref<8x128xf32, #tpu.memory_space<vmem>>, vector<8x128xf32>,
    } else {
    }
    %c0 = arith.constant 0 : index
    %c0_1 = arith.constant 0 : index
    %c0_2 = arith.constant 0 : index
    %3 = vector.load %arg2[%c0, %c0_1, %c0_2] : memref<1x8x128xf32, #tpu.memory_space<vmem>>, vector<1x8x128xf32>
    %4 = vector.shape_cast %3 : vector<1x8x128xf32> to vector<8x128xf32>
    %c0_3 = arith.constant 0 : index
    %c0_4 = arith.constant 0 : index
    %c0_5 = arith.constant 0 : index
    %5 = vector.load %arg3[%c0_3, %c0_4, %c0_5] : memref<1x8x128xf32, #tpu.memory_space<vmem>>, vector<1x8x128xf32>
    %6 = vector.shape_cast %5 : vector<1x8x128xf32> to vector<8x128xf32>
    %7 = vector.shape_cast %4 : vector<8x128xf32> to vector<1x8x128xf32>
    %8 = vector.shape_cast %6 : vector<8x128xf32> to vector<1x8x128xf32>
    %c0_6 = arith.constant 0 : index
    %c0_7 = arith.constant 0 : index
    %9 = vector.load %arg5[%c0_6, %c0_7] : memref<8x128xf32, #tpu.memory_space<vmem>>, vector<8x128xf32>
    %cst = arith.constant dense<0.000000e+00> : vector<8x128xf32>
    %10 = vector.multi_reduction <add>, %7, %cst [0] : vector<1x8x128xf32> to vector<8x128xf32>
    %11 = arith.addf %9, %10 : vector<8x128xf32>
    %c0_8 = arith.constant 0 : index
    %c0_9 = arith.constant 0 : index
    %12 = vector.load %arg5[%c0_8, %c0_9] : memref<8x128xf32, #tpu.memory_space<vmem>>, vector<8x128xf32>
    tpu.vector_store %arg5[%c0_8, %c0_9], %11 {strides = array<i32>} : memref<8x128xf32, #tpu.memory_space<vmem>>, vector<8x128xf32>,
    %c0_10 = arith.constant 0 : index
    %c0_11 = arith.constant 0 : index
    %13 = vector.load %arg6[%c0_10, %c0_11] : memref<8x128xf32, #tpu.memory_space<vmem>>, vector<8x128xf32>
    %cst_12 = arith.constant dense<0.000000e+00> : vector<8x128xf32>
    %14 = vector.multi_reduction <add>, %8, %cst_12 [0] : vector<1x8x128xf32> to vector<8x128xf32>
    %15 = arith.addf %13, %14 : vector<8x128xf32>
    %c0_13 = arith.constant 0 : index
    %c0_14 = arith.constant 0 : index
    %16 = vector.load %arg6[%c0_13, %c0_14] : memref<8x128xf32, #tpu.memory_space<vmem>>, vector<8x128xf32>
    tpu.vector_store %arg6[%c0_13, %c0_14], %15 {strides = array<i32>} : memref<8x128xf32, #tpu.memory_space<vmem>>, vector<8x128xf32>,
    %c0_15 = arith.constant 0 : index
    %c0_16 = arith.constant 0 : index
    %17 = vector.load %arg7[%c0_15, %c0_16] : memref<8x128xf32, #tpu.memory_space<vmem>>, vector<8x128xf32>
    %18 = arith.mulf %7, %7 : vector<1x8x128xf32>
    %cst_17 = arith.constant dense<0.000000e+00> : vector<8x128xf32>
    %19 = vector.multi_reduction <add>, %18, %cst_17 [0] : vector<1x8x128xf32> to vector<8x128xf32>
    %20 = arith.addf %17, %19 : vector<8x128xf32>
    %c0_18 = arith.constant 0 : index
    %c0_19 = arith.constant 0 : index
    %21 = vector.load %arg7[%c0_18, %c0_19] : memref<8x128xf32, #tpu.memory_space<vmem>>, vector<8x128xf32>
    tpu.vector_store %arg7[%c0_18, %c0_19], %20 {strides = array<i32>} : memref<8x128xf32, #tpu.memory_space<vmem>>, vector<8x128xf32>,
    %c0_20 = arith.constant 0 : index
    %c0_21 = arith.constant 0 : index
    %22 = vector.load %arg8[%c0_20, %c0_21] : memref<8x128xf32, #tpu.memory_space<vmem>>, vector<8x128xf32>
    %23 = arith.mulf %8, %8 : vector<1x8x128xf32>
    %cst_22 = arith.constant dense<0.000000e+00> : vector<8x128xf32>
    %24 = vector.multi_reduction <add>, %23, %cst_22 [0] : vector<1x8x128xf32> to vector<8x128xf32>
    %25 = arith.addf %22, %24 : vector<8x128xf32>
    %c0_23 = arith.constant 0 : index
    %c0_24 = arith.constant 0 : index
    %26 = vector.load %arg8[%c0_23, %c0_24] : memref<8x128xf32, #tpu.memory_space<vmem>>, vector<8x128xf32>
    tpu.vector_store %arg8[%c0_23, %c0_24], %25 {strides = array<i32>} : memref<8x128xf32, #tpu.memory_space<vmem>>, vector<8x128xf32>,
    %c0_25 = arith.constant 0 : index
    %c0_26 = arith.constant 0 : index
    %27 = vector.load %arg9[%c0_25, %c0_26] : memref<8x128xf32, #tpu.memory_space<vmem>>, vector<8x128xf32>
    %28 = arith.mulf %7, %8 : vector<1x8x128xf32>
    %cst_27 = arith.constant dense<0.000000e+00> : vector<8x128xf32>
    %29 = vector.multi_reduction <add>, %28, %cst_27 [0] : vector<1x8x128xf32> to vector<8x128xf32>
    %30 = arith.addf %27, %29 : vector<8x128xf32>
    %c0_28 = arith.constant 0 : index
    %c0_29 = arith.constant 0 : index
    %31 = vector.load %arg9[%c0_28, %c0_29] : memref<8x128xf32, #tpu.memory_space<vmem>>, vector<8x128xf32>
    tpu.vector_store %arg9[%c0_28, %c0_29], %30 {strides = array<i32>} : memref<8x128xf32, #tpu.memory_space<vmem>>, vector<8x128xf32>,
    %c0_i32_30 = arith.constant 0 : i32
    %32 = arith.cmpi eq, %arg1, %c0_i32_30 : i32
    %33 = arith.extui %32 : i1 to i32
    %c0_i32_31 = arith.constant 0 : i32
    %34 = arith.cmpi ne, %33, %c0_i32_31 : i32
    scf.if %34 {
      %c0_32 = arith.constant 0 : index
      %c0_33 = arith.constant 0 : index
      %35 = vector.load %arg5[%c0_32, %c0_33] : memref<8x128xf32, #tpu.memory_space<vmem>>, vector<8x128xf32>
      %36 = vector.shape_cast %35 : vector<8x128xf32> to vector<1x8x128xf32>
      %cst_34 = arith.constant dense<0.000000e+00> : vector<1xf32>
      %37 = vector.multi_reduction <add>, %36, %cst_34 [1, 2] : vector<1x8x128xf32> to vector<1xf32>
      %38 = vector.shape_cast %37 : vector<1xf32> to vector<1x1x1xf32>
      %39 = vector.extract %38[0, 0, 0] : f32 from vector<1x1x1xf32>
      %40 = vector.broadcast %39 : f32 to vector<1x1xf32>
      %c0_35 = arith.constant 0 : index
      %c0_36 = arith.constant 0 : index
      %41 = vector.load %arg6[%c0_35, %c0_36] : memref<8x128xf32, #tpu.memory_space<vmem>>, vector<8x128xf32>
      %42 = vector.shape_cast %41 : vector<8x128xf32> to vector<1x8x128xf32>
      %cst_37 = arith.constant dense<0.000000e+00> : vector<1xf32>
      %43 = vector.multi_reduction <add>, %42, %cst_37 [1, 2] : vector<1x8x128xf32> to vector<1xf32>
      %44 = vector.shape_cast %43 : vector<1xf32> to vector<1x1x1xf32>
      %45 = vector.extract %44[0, 0, 0] : f32 from vector<1x1x1xf32>
      %46 = vector.broadcast %45 : f32 to vector<1x1xf32>
      %c0_38 = arith.constant 0 : index
      %c0_39 = arith.constant 0 : index
      %47 = vector.load %arg7[%c0_38, %c0_39] : memref<8x128xf32, #tpu.memory_space<vmem>>, vector<8x128xf32>
      %48 = vector.shape_cast %47 : vector<8x128xf32> to vector<1x8x128xf32>
      %cst_40 = arith.constant dense<0.000000e+00> : vector<1xf32>
      %49 = vector.multi_reduction <add>, %48, %cst_40 [1, 2] : vector<1x8x128xf32> to vector<1xf32>
      %50 = vector.shape_cast %49 : vector<1xf32> to vector<1x1x1xf32>
      %51 = vector.extract %50[0, 0, 0] : f32 from vector<1x1x1xf32>
      %52 = vector.broadcast %51 : f32 to vector<1x1xf32>
      %c0_41 = arith.constant 0 : index
      %c0_42 = arith.constant 0 : index
      %53 = vector.load %arg8[%c0_41, %c0_42] : memref<8x128xf32, #tpu.memory_space<vmem>>, vector<8x128xf32>
      %54 = vector.shape_cast %53 : vector<8x128xf32> to vector<1x8x128xf32>
      %cst_43 = arith.constant dense<0.000000e+00> : vector<1xf32>
      %55 = vector.multi_reduction <add>, %54, %cst_43 [1, 2] : vector<1x8x128xf32> to vector<1xf32>
      %56 = vector.shape_cast %55 : vector<1xf32> to vector<1x1x1xf32>
      %57 = vector.extract %56[0, 0, 0] : f32 from vector<1x1x1xf32>
      %58 = vector.broadcast %57 : f32 to vector<1x1xf32>
      %c0_44 = arith.constant 0 : index
      %c0_45 = arith.constant 0 : index
      %59 = vector.load %arg9[%c0_44, %c0_45] : memref<8x128xf32, #tpu.memory_space<vmem>>, vector<8x128xf32>
      %60 = vector.shape_cast %59 : vector<8x128xf32> to vector<1x8x128xf32>
      %cst_46 = arith.constant dense<0.000000e+00> : vector<1xf32>
      %61 = vector.multi_reduction <add>, %60, %cst_46 [1, 2] : vector<1x8x128xf32> to vector<1xf32>
      %62 = vector.shape_cast %61 : vector<1xf32> to vector<1x1x1xf32>
      %63 = vector.extract %62[0, 0, 0] : f32 from vector<1x1x1xf32>
      %64 = vector.broadcast %63 : f32 to vector<1x1xf32>
      %cst_47 = arith.constant 3.906250e-03 : f32
      %65 = vector.broadcast %cst_47 : f32 to vector<1x1xf32>
      %66 = arith.mulf %40, %65 : vector<1x1xf32>
      %cst_48 = arith.constant 3.906250e-03 : f32
      %67 = vector.broadcast %cst_48 : f32 to vector<1x1xf32>
      %68 = arith.mulf %46, %67 : vector<1x1xf32>
      %69 = arith.mulf %40, %40 : vector<1x1xf32>
      %cst_49 = arith.constant 3.906250e-03 : f32
      %70 = vector.broadcast %cst_49 : f32 to vector<1x1xf32>
      %71 = arith.mulf %69, %70 : vector<1x1xf32>
      %72 = arith.subf %52, %71 : vector<1x1xf32>
      %cst_50 = arith.constant 2.550000e+02 : f32
      %73 = vector.broadcast %cst_50 : f32 to vector<1x1xf32>
      %74 = arith.divf %72, %73 : vector<1x1xf32>
      %75 = arith.mulf %46, %46 : vector<1x1xf32>
      %cst_51 = arith.constant 3.906250e-03 : f32
      %76 = vector.broadcast %cst_51 : f32 to vector<1x1xf32>
      %77 = arith.mulf %75, %76 : vector<1x1xf32>
      %78 = arith.subf %58, %77 : vector<1x1xf32>
      %cst_52 = arith.constant 2.550000e+02 : f32
      %79 = vector.broadcast %cst_52 : f32 to vector<1x1xf32>
      %80 = arith.divf %78, %79 : vector<1x1xf32>
      %cst_53 = arith.constant 3.906250e-03 : f32
      %81 = vector.broadcast %cst_53 : f32 to vector<1x1xf32>
      %82 = arith.mulf %64, %81 : vector<1x1xf32>
      %83 = arith.mulf %66, %68 : vector<1x1xf32>
      %84 = arith.subf %82, %83 : vector<1x1xf32>
      %cst_54 = arith.constant 4.000000e+00 : f32
      %85 = vector.broadcast %cst_54 : f32 to vector<1x1xf32>
      %86 = arith.mulf %85, %84 : vector<1x1xf32>
      %87 = arith.mulf %86, %66 : vector<1x1xf32>
      %88 = arith.mulf %87, %68 : vector<1x1xf32>
      %89 = arith.addf %74, %80 : vector<1x1xf32>
      %90 = arith.mulf %66, %66 : vector<1x1xf32>
      %91 = arith.mulf %68, %68 : vector<1x1xf32>
      %92 = arith.addf %90, %91 : vector<1x1xf32>
      %93 = arith.mulf %89, %92 : vector<1x1xf32>
      %94 = arith.divf %88, %93 : vector<1x1xf32>
      %95 = vector.shape_cast %94 : vector<1x1xf32> to vector<1x1xf32>
      %96 = vector.broadcast %95 : vector<1x1xf32> to vector<8x128xf32>
      %c0_55 = arith.constant 0 : index
      %c0_56 = arith.constant 0 : index
      %c0_57 = arith.constant 0 : index
      %97 = vector.load %arg4[%c0_55, %c0_56, %c0_57] : memref<1x8x128xf32, #tpu.memory_space<vmem>>, vector<1x8x128xf32>
      %98 = vector.shape_cast %97 : vector<1x8x128xf32> to vector<8x128xf32>
      %99 = vector.shape_cast %96 : vector<8x128xf32> to vector<1x8x128xf32>
      tpu.vector_store %arg4[%c0_55, %c0_56, %c0_57], %99 {strides = array<i32>} : memref<1x8x128xf32, #tpu.memory_space<vmem>>, vector<1x8x128xf32>,
    } else {
    }
    return
  }
  func.func @transform_0(%arg0: i32, %arg1: i32) -> (i32, i32, i32) {
    %c0_i32 = arith.constant 0 : i32
    %c0_i32_0 = arith.constant 0 : i32
    return %arg0, %arg1, %c0_i32 : i32, i32, i32
  }
  func.func @transform_1(%arg0: i32, %arg1: i32) -> (i32, i32, i32) {
    %c0_i32 = arith.constant 0 : i32
    %c0_i32_0 = arith.constant 0 : i32
    return %arg0, %arg1, %c0_i32 : i32, i32, i32
  }
  func.func @transform_2(%arg0: i32, %arg1: i32) -> (i32, i32, i32) {
    %c0_i32 = arith.constant 0 : i32
    %c0_i32_0 = arith.constant 0 : i32
    %c0_i32_1 = arith.constant 0 : i32
    return %arg0, %c0_i32, %c0_i32_0 : i32, i32, i32
  }
}

</mosaic_0001>

<bundles_post_ra>
// kernel: tpu_custom_call.1
= control target key start
LH: loop header
LB: loop body
LE: loop exit
PB: predicated region body
PF: predicated region fallthrough
CT: control target
= control target key end

     0   :  { %7 = vsyncpa [#allocation8], 0  ;;  %s934_s0 = inlined_call_operand.hbm [shape: f32[2,8,128], index: 0, kind: input, shape index: {}]   ;;  %s935_s1 = inlined_call_operand.hbm [shape: f32[2,8,128], index: 1, kind: input, shape index: {}]   ;;  %s936_s2 = inlined_call_operand.hbm [shape: f32[2,8,128], index: 2, kind: output, shape index: {}]  }
   0x1   :  { %9 = vsyncpa [#allocation8 + $0x1], 0 }
   0x2   :  { %10 = vsyncpa [#allocation11], 0 }
   0x3   :  { %12 = vsyncpa [#allocation11 + $0x1], 0 }
   0x4   :  { %13 = vsyncpa [#allocation9], 0 }
   0x5   :  { %15 = vsyncpa [#allocation9 + $0x1], 0  ;;  %s709_s9 = smov 0   ;;  %s711_s10 = smov 0  }
   0x6   :  { %s713_s11 = smov 0   ;;  %s715_s12 = smov 0  }
   0x7   :  { %s717_s13 = smov 0   ;;  %s719_s14 = smov 0  }
   0x8 LB: > { %s448_s15 = sadd.s32 4294967295, %s689_s14   ;;  %s449_s16 = sadd.s32 4294967294, %s689_s14   ;;  %s689_s14 = sphi %s719_s14, %s21_s14   ;;  %s685_s13 = sphi %s717_s13, %s956_s13   ;;  %s681_s12 = sphi %s715_s12, %s955_s12   ;;  %s677_s11 = sphi %s713_s11, %s954_s11   ;;  %s673_s10 = sphi %s711_s10, %s953_s10   ;;  %s669_s9 = sphi %s709_s9, %s952_s9  }
   0x9   : > { %s33_s17 = sadd.s32 1, %s685_s13  ;;  %s42_s18 = sadd.s32 1, %s677_s11 }
   0xa   : > { %p35_p0 = scmp.ge.s32.totalorder %s33_s17, 2  ;;  %p49_p1 = scmp.ne.s32.totalorder %s677_s11, %s673_s10 }
   0xb   : > { %p50_p2 = scmp.eq.s32.totalorder %s689_s14, 0  ;;  %p55_p3 = scmp.ne.s32.totalorder %s673_s10, %s669_s9 }
   0xc   : > { %s958_s17 = smov (%p35_p0, %s33_s17), 0  ;;  %p56_p5 = scmp.eq.s32.totalorder %s448_s15, 0 }
   0xd   : > { %p750_p4 = por %p50_p2, %p49_p1  ;;  %s37_s20 = ssub.s32 %s685_s13, %s958_s17 }
   0xe   : > { %p107_p6 = scmp.eq.s32.totalorder %s448_s15, 1  ;;  %p40_p7 = scmp.eq.s32.totalorder %s37_s20, 0 }
   0xf   : > { %p756_p8 = por %p56_p5, %p55_p3  ;;  %p113_p10 = scmp.eq.s32.totalorder %s449_s16, 1 }
  0x10   : > { %p760_p9 = por %p107_p6, %p49_p1  ;;  %p491_p13 = scmp.lt.s32.totalorder %s689_s14, 2 }
  0x11   : > { %s940_s21 = scalar_select %p756_p8, 1, 0 }
  0x12   : > { %s941_s22 = scalar_select %p760_p9, 1, 0 }
  0x13   : > { %s765_s23 = scalar_select %p40_p7, %s677_s11, %s42_s18  }
  0x14   : > { %p767_p11 = por %p113_p10, %p55_p3  ;;  %s774_s25 = sand.u32 1, %s677_s11  }
  0x15   : > { %s452_s26 = sshll.u32 %s774_s25, 3  ;;  %s453_s27 = sshll.u32 %s685_s13, 7 }
  0x16   : > { %s942_s24 = scalar_select %p767_p11, 1, 0 }
  0x17   : > { %s783_s30 = scalar_lea.hbm %s934_s0, %s453_s27  ;;  %s137_s3 = scalar_lea.vmem [#allocation7], %s452_s26 }
  0x18   : > { %s145_s4 = sshll.u32 %s137_s3, 4  ;;  %p791_p0 = pnand %p491_p13, %p750_p4  ;;  %s787_s4 = int_to_ptr.vmem [resolvable:$true] %s145_s4 }
  0x19   : > { %s134_s6 = scalar_lea.sflag [#allocation8], %s774_s25  ;;  %s543_s7 = scalar_lea.hbm %s783_s30, 128 }
  0x1a   : > { %p544_p3 = scmp.ne.s32.totalorder %s783_s30, %s543_s7  ;;  %p545_p5 = pneg %p791_p0 }
  0x1b   : > { %s548_s16 = scalar_lea.hbm %s934_s0, 256  ;;  %p549_p4 = scmp.lt.u32.totalorder %s783_s30, %s934_s0 }
  0x1c   : > { %p546_p6 = pnand %p545_p5, %p544_p3  ;;  %p550_p10 = scmp.lt.u32.totalorder %s548_s16, %s543_s7 }
  0x1d   : > { %p552_p12 = scmp.lt.u32.totalorder %s543_s7, %s783_s30 }
  0x1e   : > { %p547_p7 = pneg %p546_p6  ;;  %p551_p13 = por %p550_p10, %p549_p4 }
  0x20   : > { %p553_p1 = por %p552_p12, %p551_p13 }
  0x22   : > { %p554_p2 = pnand %p553_p1, %p547_p7 }
  0x24   : > { %557 = shalt.err (!%p554_p2)
}
  0x25   : > { %s558_s20 = scalar_lea.vmem %s787_s4, 128  ;;  %s691_s28 = smov [#allocation7]  }
  0x26   : > { %p559_p3 = scmp.ne.s32.totalorder %s787_s4, %s558_s20  ;;  %s563_s29 = sshll.u32 %s691_s28, 4  ;;  %s564_s29 = int_to_ptr.vmem [resolvable:$false] %s563_s29 }
  0x27   : > { %s565_s3 = scalar_lea.vmem %s564_s29, 256  ;;  %p566_p9 = scmp.lt.s32.totalorder %s787_s4, %s564_s29 }
  0x28   : > { %p561_p6 = pnand %p559_p3, %p545_p5  ;;  %p567_p4 = scmp.lt.s32.totalorder %s565_s3, %s558_s20 }
  0x2a   : > { %p562_p11 = pneg %p561_p6  ;;  %p568_p10 = por %p567_p4, %p566_p9 }
  0x2c   : > { %p569_p12 = pnand %p568_p10, %p562_p11 }
  0x2e   : > { %572 = shalt.err (!%p569_p12)
}
  0x2f   : > { %483 = dma.hbm_to_vmem [thread:$0]  (!%p791_p0), %s783_s30, 128, %s787_s4, %s134_s6  }
  0x30   : > { %p944_p1 = scmp.lt.s32.totalorder %s689_s14, 3  ;;  %p945_p2 = scmp.ge.s32.totalorder %s689_s14, 1 }
  0x31   : > { %s836_s16 = scalar_lea.hbm %s935_s1, %s453_s27  ;;  %s156_s18 = scalar_lea.vmem [#allocation10], %s452_s26 }
  0x32   : > { %p827_p7 = pnand %p945_p2, %p944_p1  ;;  %s164_s19 = sshll.u32 %s156_s18, 4  ;;  %s165_s19 = int_to_ptr.vmem [resolvable:$true] %s164_s19 }
  0x33   : > { %s153_s30 = scalar_lea.sflag [#allocation11], %s774_s25  ;;  %s573_s4 = scalar_lea.hbm %s836_s16, 128 }
  0x34   : > { %s946_s7 = scalar_select %p827_p7, 1, 0 }
  0x35   : > { %p574_p9 = scmp.ne.s32.totalorder %s836_s16, %s573_s4  ;;  %s578_s27 = scalar_lea.hbm %s935_s1, 256 }
  0x36   : > { %p579_p3 = scmp.lt.u32.totalorder %s836_s16, %s935_s1  ;;  %p580_p6 = scmp.lt.u32.totalorder %s578_s27, %s573_s4 }
  0x37   : > { %p576_p11 = pnand %p574_p9, %p545_p5  ;;  %p582_p10 = scmp.lt.u32.totalorder %s573_s4, %s836_s16 }
  0x38   : > { %p581_p4 = por %p580_p6, %p579_p3 }
  0x39   : > { %p577_p13 = pneg %p576_p11 }
  0x3a   : > { %p583_p12 = por %p582_p10, %p581_p4 }
  0x3c   : > { %p584_p1 = pnand %p583_p12, %p577_p13 }
  0x3e   : > { %587 = shalt.err (!%p584_p1)
}
  0x3f   : > { %s588_s25 = scalar_lea.vmem %s165_s19, 128  ;;  %s692_s26 = smov [#allocation10]  }
  0x40   : > { %p589_p2 = scmp.ne.s32.totalorder %s165_s19, %s588_s25  ;;  %s593_s3 = sshll.u32 %s692_s26, 4  ;;  %s594_s3 = int_to_ptr.vmem [resolvable:$false] %s593_s3 }
  0x41   : > { %s595_s8 = scalar_lea.vmem %s594_s3, 256  ;;  %p596_p8 = scmp.lt.s32.totalorder %s165_s19, %s594_s3 }
  0x42   : > { %p591_p9 = pnand %p589_p2, %p545_p5  ;;  %p597_p7 = scmp.lt.s32.totalorder %s595_s8, %s588_s25 }
  0x44   : > { %p592_p11 = pneg %p591_p9  ;;  %p598_p3 = por %p597_p7, %p596_p8 }
  0x46   : > { %p599_p6 = pnand %p598_p3, %p592_p11 }
  0x48   : > { %602 = shalt.err (!%p599_p6)
}
  0x49   : > { %486 = dma.hbm_to_vmem [thread:$0]  (!%p791_p0), %s836_s16, 128, %s165_s19, %s153_s30  }
  0x4a   : > { %p947_p13 = scmp.ne.s32.totalorder %s946_s7, 0 }
  0x4b   : > { %s863_s15 = sand.u32 (!%p947_p13), 1, %s673_s10   ;;  %p948_p8 = scmp.ne.s32.totalorder (!%p947_p13), %s940_s21, 0 }
  0x4c   : > { %173 = sbr.rel (%p947_p13) target bundleno = 335 (0x14f), region = 28  ;;  %s866_s18 = sshll.u32 (!%p947_p13), %s863_s15, 3 }
  0x4d   : > { %s176_s4 = scalar_lea.sflag (!%p947_p13), [#allocation8], %s863_s15  ;;  %s179_s6 = scalar_lea.vmem (!%p947_p13), [#allocation7], %s866_s18 }
  0x53   : > { %656 = dma.done.wait (%p948_p8), %s176_s4, 128  }
  0x54   : > { %658 = vsyncadd (%p948_p8), %s176_s4, 4294967168  ;;  %s185_s5 = scalar_lea.sflag [#allocation11], %s863_s15  ;;  %s188_s7 = scalar_lea.vmem [#allocation10], %s866_s18 }
  0x55   : > { %660 = dma.done.wait (%p948_p8), %s185_s5, 128  }
  0x56   : > { %662 = vsyncadd (%p948_p8), %s185_s5, 4294967168  ;;  %v223_v0 = vld [vmem:[%s179_s6] sm:$0xff]  ;;  %v224_v1 = vld [vmem:[%s188_s7] sm:$0xff]  ;;  %s461_s27 = sshll.u32 %s681_s12, 7  ;;  %s213_s28 = scalar_lea.vmem [#allocation12], %s866_s18 }
  0x57   : > { %252 = vadd.xlane.f32.xlu0 %v223_v0  ;;  %v234_v2 = vmul.f32 %v223_v0, %v223_v0  ;;  %v239_v3 = vmul.f32 %v224_v1, %v224_v1  ;;  %v244_v4 = vmul.f32 %v224_v1, %v223_v0  ;;  %s345_s29 = sshll.u32 %s213_s28, 4  ;;  %s885_s3 = scalar_lea.hbm %s936_s2, %s461_s27  ;;  %s887_s29 = int_to_ptr.vmem [resolvable:$true] %s345_s29 }
  0x58   : > { %s332_s8 = scalar_lea.sflag [#allocation9], %s863_s15  ;;  %s603_s4 = scalar_lea.vmem %s887_s29, 128 }
  0x59   : > { %274 = vadd.xlane.f32.xlu1 %v234_v2  ;;  %p604_p0 = scmp.ne.s32.totalorder %s887_s29, %s603_s4  ;;  %p949_p5 = scmp.ne.s32.totalorder %s941_s22, 0 }
  0x5a   : > { %s693_s12 = smov [#allocation12]  }
  0x5b   : > { %263 = vadd.xlane.f32.xlu0 %v224_v1  ;;  %p605_p7 = pnand %p604_p0, %p949_p5  ;;  %s607_s18 = sshll.u32 %s693_s12, 4  ;;  %s608_s18 = int_to_ptr.vmem [resolvable:$false] %s607_s18 }
  0x5c   : > { %s609_s6 = scalar_lea.vmem %s608_s18, 256  ;;  %p610_p10 = scmp.lt.s32.totalorder %s887_s29, %s608_s18 }
  0x5d   : > { %285 = vadd.xlane.f32.xlu1 %v239_v3  ;;  %p606_p4 = pneg %p605_p7  ;;  %p611_p12 = scmp.lt.s32.totalorder %s609_s6, %s603_s4 }
  0x5f   : > { %296 = vadd.xlane.f32.xlu0 %v244_v4  ;;  %p612_p1 = por %p611_p12, %p610_p10 }
  0x61   : > { %p613_p2 = pnand %p612_p1, %p606_p4 }
  0xe4   : > { %v253_v5 = vpop.xlane.xlu0 %252 }
  0xe5   : > { %v254_v6 = vrot.slane %v253_v5, 4 }
  0xe6   : > { %v275_v7 = vpop.xlane.xlu1 %274 }
  0xe7   : > { %v255_v8 = vadd.f32 %v254_v6, %v253_v5  ;;  %v276_v9 = vrot.slane %v275_v7, 4 }
  0xe8   : > { %v264_v10 = vpop.xlane.xlu0 %263 }
  0xe9   : > { %v256_v11 = vrot.slane %v255_v8, 2  ;;  %v277_v12 = vadd.f32 %v276_v9, %v275_v7  ;;  %v265_v13 = vrot.slane %v264_v10, 4 }
  0xea   : > { %v286_v14 = vpop.xlane.xlu1 %285 }
  0xeb   : > { %v278_v15 = vrot.slane %v277_v12, 2  ;;  %v266_v16 = vadd.f32 %v265_v13, %v264_v10  ;;  %v287_v17 = vrot.slane %v286_v14, 4  ;;  %v257_v18 = vadd.f32 %v256_v11, %v255_v8 }
  0xec   : > { %v297_v19 = vpop.xlane.xlu0 %296 }
  0xed   : > { %v267_v20 = vrot.slane %v266_v16, 2  ;;  %v288_v21 = vadd.f32 %v287_v17, %v286_v14  ;;  %v298_v22 = vrot.slane %v297_v19, 4  ;;  %v258_v23 = vrot.slane %v257_v18, 1 }
  0xee   : > { %v279_v24 = vadd.f32 %v278_v15, %v277_v12 }
  0xef   : > { %v289_v25 = vrot.slane %v288_v21, 2  ;;  %v299_v26 = vadd.f32 %v298_v22, %v297_v19  ;;  %v259_v27 = vadd.f32 %v258_v23, %v257_v18  ;;  %v268_v28 = vadd.f32 %v267_v20, %v266_v16 }
  0xf0   : > { %v280_v29 = vrot.slane %v279_v24, 1 }
  0xf1   : > { %v290_v30 = vadd.f32 %v289_v25, %v288_v21  ;;  %v300_v31 = vrot.slane %v299_v26, 2  ;;  %464 = vpush %v259_v27  ;;  %v269_v32 = vrot.slane %v268_v28, 1 }
  0xf2   : > { %v281_v36 = vadd.f32 %v280_v29, %v279_v24 }
  0xf3   : > { %v301_v33 = vadd.f32 %v300_v31, %v299_v26  ;;  %v270_v34 = vadd.f32 %v269_v32, %v268_v28  ;;  %v291_v35 = vrot.slane %v290_v30, 1 }
  0xf5   : > { %466 = vpush %v270_v34  ;;  %v292_v37 = vadd.f32 %v291_v35, %v290_v30  ;;  %v302_v38 = vrot.slane %v301_v33, 1 }
  0xf6   : > { %468 = vpush %v281_v36 }
  0xf7   : > { %470 = vpush %v292_v37  ;;  %v303_v39 = vadd.f32 %v302_v38, %v301_v33 }
  0xf9   : > { %472 = vpush %v303_v39 }
 0x122   : > { %s465_s21 = spop %464 }
 0x123   : > { %v261_v40 = vstv %s465_s21 }
 0x124   : > { %v308_v41 = vmul.f32 %v261_v40, %v261_v40  ;;  %v306_v47 = vmul.f32 0.00390625, %v261_v40 }
 0x126   : > { %v309_v42 = vmul.f32 0.00390625, %v308_v41  ;;  %s467_s16 = spop %466  ;;  %v324_v55 = vmul.f32 %v306_v47, %v306_v47 }
 0x127   : > { %v272_v43 = vstv %s467_s16  ;;  %s469_s19 = spop %468 }
 0x128   : > { %v307_v44 = vmul.f32 0.00390625, %v272_v43  ;;  %v313_v45 = vmul.f32 %v272_v43, %v272_v43  ;;  %v283_v46 = vstv %s469_s19  ;;  %s471_s30 = spop %470 }
 0x129   : > { %v310_v49 = vsub.f32 %v283_v46, %v309_v42  ;;  %v294_v50 = vstv %s471_s30 }
 0x12a   : > { %v314_v48 = vmul.f32 0.00390625, %v313_v45  ;;  %s473_s20 = spop %472  ;;  %v325_v52 = vmul.f32 %v307_v44, %v307_v44  ;;  %v318_v58 = vmul.f32 %v307_v44, %v306_v47 }
 0x12b   : > { %v305_v51 = vstv %s473_s20  ;;  %v312_v56 = vmul.f32 0.003921569, %v310_v49 }
 0x12c   : > { %v315_v53 = vsub.f32 %v294_v50, %v314_v48  ;;  %v317_v54 = vmul.f32 0.00390625, %v305_v51  ;;  %v326_v60 = vadd.f32 %v325_v52, %v324_v55 }
 0x12e   : > { %v316_v57 = vmul.f32 0.003921569, %v315_v53  ;;  %v319_v61 = vsub.f32 %v317_v54, %v318_v58 }
 0x130   : > { %v323_v59 = vadd.f32 %v316_v57, %v312_v56  ;;  %v320_v63 = vmul.f32 4.0, %v319_v61 }
 0x132   : > { %v327_v62 = vmul.f32 %v326_v60, %v323_v59  ;;  %v321_v0 = vmul.f32 %v320_v63, %v306_v47 }
 0x134   : > { %541 = vrcp.f32 %v327_v62  ;;  %v322_v1 = vmul.f32 %v321_v0, %v307_v44 }
 0x13e   : > { %v542_v2 = vpop.eup %541 }
 0x13f   : > { %v329_v3 = vmul.f32 %v542_v2, %v322_v1 }
 0x141   : > { %330 = vst [vmem:[%s213_s28] sm:$0xff] %v329_v3 }
 0x142   : > { %616 = shalt.err (!%p613_p2)
}
 0x143   : > { %s617_s15 = scalar_lea.hbm %s885_s3, 128  ;;  %s621_s21 = scalar_lea.hbm %s936_s2, 256 }
 0x144   : > { %p618_p9 = scmp.ne.s32.totalorder %s885_s3, %s617_s15  ;;  %p622_p6 = scmp.lt.u32.totalorder %s885_s3, %s936_s2 }
 0x145   : > { %p623_p13 = scmp.lt.u32.totalorder %s621_s21, %s617_s15  ;;  %p625_p0 = scmp.lt.u32.totalorder %s617_s15, %s885_s3 }
 0x146   : > { %p619_p11 = pnand %p618_p9, %p949_p5 }
 0x147   : > { %p624_p8 = por %p623_p13, %p622_p6 }
 0x148   : > { %p620_p3 = pneg %p619_p11 }
 0x149   : > { %p626_p7 = por %p625_p0, %p624_p8 }
 0x14b   : > { %p627_p4 = pnand %p626_p7, %p620_p3 }
 0x14d   : > { %630 = shalt.err (!%p627_p4)
}
 0x14e   : > { %478 = dma.vmem_to_hbm [thread:$0]  (%p949_p5), %s887_s29, 128, %s885_s3, %s332_s8  }
 0x14f PF: > { %s357_s30 = sand.u32 1, %s669_s9   ;;  %p950_p10 = scmp.ne.s32.totalorder %s942_s24, 0 }
 0x150   : > { %p951_p12 = scmp.ge.s32.totalorder %s689_s14, 2  ;;  %s358_s20 = scalar_lea.sflag [#allocation9], %s357_s30 }
 0x152   : > { %p488_p1 = pnand %p951_p12, %p950_p10 }
 0x154   : > { %664 = dma.done.wait (!%p488_p1), %s358_s20, 128  }
 0x155   : > { %666 = vsyncadd (!%p488_p1), %s358_s20, 4294967168  ;;  %s21_s14 = sadd.s32 1, %s689_s14   ;;  %s952_s9 = smov %s673_s10 }
 0x156   : > { %p18_p2 = scmp.ge.s32.totalorder %s21_s14, 4   ;;  %s953_s10 = smov %s677_s11 }
 0x157   : > { %s954_s11 = smov %s765_s23  ;;  %s955_s12 = smov %s685_s13 }
 0x158   : > { %s956_s13 = smov %s958_s17  ;;  %20 = sbr.rel (!%p18_p2) target bundleno = 8 (0x8), region = 94 }
 0x15f   :  { %363 = vsyncpa [#allocation8], 1 }
 0x160   :  { %365 = vsyncpa [#allocation8 + $0x1], 1 }
 0x161   :  { %366 = vsyncpa [#allocation11], 1 }
 0x162   :  { %368 = vsyncpa [#allocation11 + $0x1], 1 }
 0x163   :  { %369 = vsyncpa [#allocation9], 1 }
 0x164   :  { %371 = vsyncpa [#allocation9 + $0x1], 1 }

</bundles_post_ra>
